<compile_context>
chip_gen: v6e
topology: v6e:2x2x1
jax: 0.10.0
libtpu: 0.0.40
codegen_flags: <defaults>
</compile_context>

<pallas_src>
import jax
import jax.numpy as jnp
import numpy as np
from jax.experimental import pallas as pl
from jax.experimental.pallas import tpu as pltpu

S = 7
B = 2
C = 20
FEAT = C + B * 5          # 30
LAMBDA_NOOBJ = 4.0
LAMBDA_COORD = 10.0
LAMBDA_CLASS = 2.0

MAX_TILE = 8192           # 2 inputs x 2 buffers x 30 x 8192 x 4B ~= 3.8 MiB VMEM


def _round_up(x, m):
    return ((x + m - 1) // m) * m


def yolo_loss_kernel(pred_ref, targ_ref, out_ref):
    # pred_ref, targ_ref: (30, T) f32 blocks — features on sublanes, cells on lanes.
    # out_ref: (1, 1) f32 scalar loss accumulator, resident across the whole grid.

    # ---- target box (shared between both IoU evaluations) ----
    txy = targ_ref[21:23, :]                      # (2, T): cx, cy
    twh = targ_ref[23:25, :]                      # (2, T): w, h
    t_half = 0.5 * twh
    t_lo = txy - t_half                           # (2, T) lower corners (x, y)
    t_hi = txy + t_half                           # (2, T) upper corners (x, y)
    t_area = jnp.abs(twh[0:1, :] * twh[1:2, :])   # (1, T)

    def iou(pxy, pwh):
        """IoU (midpoint format) of a predicted box vs the target box. (1, T)."""
        p_half = 0.5 * pwh
        lo = jnp.maximum(pxy - p_half, t_lo)      # (2, T)
        hi = jnp.minimum(pxy + p_half, t_hi)      # (2, T)
        ext = jnp.maximum(hi - lo, 0.0)           # (2, T) clamped overlap extents
        inter = ext[0:1, :] * ext[1:2, :]         # (1, T)
        p_area = jnp.abs(pwh[0:1, :] * pwh[1:2, :])
        return inter / (p_area + t_area - inter + 1e-6)

    pxy1 = pred_ref[21:23, :]                     # box 1 centre (x, y)
    pwh1 = pred_ref[23:25, :]                     # box 1 (w, h)
    pxy2 = pred_ref[26:28, :]                     # box 2 centre (x, y)
    pwh2 = pred_ref[28:30, :]                     # box 2 (w, h)

    iou1 = iou(pxy1, pwh1)
    iou2 = iou(pxy2, pwh2)
    # torch.max over stacked [iou1, iou2]: index 1 only when strictly larger.
    best2 = iou2 > iou1                           # (1, T) bool

    exists = targ_ref[20:21, :]                   # (1, T), objectness target in {0, 1}
    noobj = 1.0 - exists

    # ---- box coordinate loss (mask applied AFTER the sublane reduction) ----
    bxy = jnp.where(best2, pxy2, pxy1)            # (2, T) responsible box centre
    bwh = jnp.where(best2, pwh2, pwh1)            # (2, T) responsible box w/h
    # torch.sign semantics (sign(0) == 0) built from compares/selects.
    sgn = (jnp.where(bwh > 0.0, 1.0, 0.0) - jnp.where(bwh < 0.0, 1.0, 0.0))
    bwh_s = sgn * jnp.sqrt(jnp.abs(bwh + 1e-6))
    # Clamp keeps padded / no-object cells NaN-free; exact for valid labels (w,h >= 0).
    twh_s = jnp.sqrt(jnp.maximum(twh, 0.0))
    box_err = (jnp.sum((bxy - txy) ** 2, axis=0, keepdims=True)
               + jnp.sum((bwh_s - twh_s) ** 2, axis=0, keepdims=True))
    box_part = exists * box_err                   # (1, T)

    # ---- object / no-object confidence losses ----
    p20 = pred_ref[20:21, :]
    p25 = pred_ref[25:26, :]
    pc = jnp.where(best2, p25, p20)               # responsible confidence
    obj_part = exists * (pc - exists) ** 2        # target confidence == exists
    noobj_part = noobj * ((p20 - exists) ** 2 + (p25 - exists) ** 2)

    # ---- class loss ----
    cls_err = jnp.sum((pred_ref[0:20, :] - targ_ref[0:20, :]) ** 2,
                      axis=0, keepdims=True)      # (1, T)
    class_part = exists * cls_err

    cell = (LAMBDA_COORD * box_part
            + obj_part
            + LAMBDA_NOOBJ * noobj_part
            + LAMBDA_CLASS * class_part)          # (1, T)
    tile_total = jnp.sum(cell, keepdims=True)     # (1, 1)

    @pl.when(pl.program_id(0) == 0)
    def _init():
        out_ref[...] = jnp.zeros_like(out_ref)

    out_ref[...] += tile_total


def yolo_loss(predictions, target):
    """predictions: (N, S*S*30) or (N, S, S, 30); target: (N, S, S, 30)."""
    pred2d = jnp.reshape(predictions, (-1, FEAT)).astype(jnp.float32)
    targ2d = jnp.reshape(target, (-1, FEAT)).astype(jnp.float32)
    m = pred2d.shape[0]

    # Adaptive tiling: single tile for typical YOLOv1 sizes, balanced <=8192-wide
    # tiles (little padding waste) for genuinely large inputs.
    if m <= MAX_TILE:
        num_tiles = 1
        tile = _round_up(m, 128)
    else:
        num_tiles = -(-m // MAX_TILE)
        tile = _round_up(-(-m // num_tiles), 128)
    m_pad = num_tiles * tile

    def to_slab(x):
        # (m, 30) -> (30, m_pad): one fused pad+transpose.  Padded cells are
        # all-zero and contribute exactly 0 to every loss term.
        return jnp.pad(x, ((0, m_pad - m), (0, 0))).T

    pred_slab = to_slab(pred2d)
    targ_slab = to_slab(targ2d)

    in_spec = pl.BlockSpec((FEAT, tile), lambda i: (0, i))
    cost = pl.CostEstimate(flops=160 * m_pad,
                           transcendentals=6 * m_pad,
                           bytes_accessed=2 * FEAT * 4 * m_pad + 4)

    loss = pl.pallas_call(
        yolo_loss_kernel,
        out_shape=jax.ShapeDtypeStruct((1, 1), jnp.float32),
        grid_spec=pltpu.PrefetchScalarGridSpec(
            num_scalar_prefetch=0,
            grid=(num_tiles,),
            in_specs=[in_spec, in_spec],
            # Same (1,1) block every step -> resident accumulator across the grid.
            out_specs=pl.BlockSpec((1, 1), lambda i: (0, 0)),
        ),
        compiler_params=pltpu.CompilerParams(
            dimension_semantics=("arbitrary",),
            vmem_limit_bytes=32 * 1024 * 1024),
        cost_estimate=cost,
    )(pred_slab, targ_slab)

    return loss[0, 0]


def yolo_loss_reference(predictions, target):
    """Pure-JAX transcription of the PyTorch YoloLoss forward (for checking)."""
    p = jnp.reshape(predictions, (-1, S, S, FEAT)).astype(jnp.float32)
    t = jnp.asarray(target, jnp.float32)

    def iou(a, b):
        ax1 = a[..., 0:1] - a[..., 2:3] / 2
        ay1 = a[..., 1:2] - a[..., 3:4] / 2
        ax2 = a[..., 0:1] + a[..., 2:3] / 2
        ay2 = a[..., 1:2] + a[..., 3:4] / 2
        bx1 = b[..., 0:1] - b[..., 2:3] / 2
        by1 = b[..., 1:2] - b[..., 3:4] / 2
        bx2 = b[..., 0:1] + b[..., 2:3] / 2
        by2 = b[..., 1:2] + b[..., 3:4] / 2
        x1 = jnp.maximum(ax1, bx1)
        y1 = jnp.maximum(ay1, by1)
        x2 = jnp.minimum(ax2, bx2)
        y2 = jnp.minimum(ay2, by2)
        inter = jnp.clip(x2 - x1, 0.0) * jnp.clip(y2 - y1, 0.0)
        a_area = jnp.abs((ax2 - ax1) * (ay2 - ay1))
        b_area = jnp.abs((bx2 - bx1) * (by2 - by1))
        return inter / (a_area + b_area - inter + 1e-6)

    iou_b1 = iou(p[..., 21:25], t[..., 21:25])
    iou_b2 = iou(p[..., 26:30], t[..., 21:25])
    bestbox = (iou_b2 > iou_b1).astype(jnp.float32)
    exists = t[..., 20:21]

    box_pred = exists * (bestbox * p[..., 26:30] + (1 - bestbox) * p[..., 21:25])
    box_targ = exists * t[..., 21:25]
    bp = box_pred.at[..., 2:4].set(
        jnp.sign(box_pred[..., 2:4]) * jnp.sqrt(jnp.abs(box_pred[..., 2:4] + 1e-6)))
    bt = box_targ.at[..., 2:4].set(jnp.sqrt(box_targ[..., 2:4]))
    box_loss = jnp.sum((bp - bt) ** 2)

    pred_box = bestbox * p[..., 25:26] + (1 - bestbox) * p[..., 20:21]
    object_loss = jnp.sum((exists * pred_box - exists * t[..., 20:21]) ** 2)

    no_object_loss = jnp.sum(((1 - exists) * p[..., 20:21]
                              - (1 - exists) * t[..., 20:21]) ** 2)
    no_object_loss += jnp.sum(((1 - exists) * p[..., 25:26]
                               - (1 - exists) * t[..., 20:21]) ** 2)

    class_loss = jnp.sum((exists * p[..., :20] - exists * t[..., :20]) ** 2)

    return (LAMBDA_COORD * box_loss + object_loss
            + LAMBDA_NOOBJ * no_object_loss + LAMBDA_CLASS * class_loss)


if __name__ == "__main__":
    key = jax.random.PRNGKey(0)
    k1, k2, k3 = jax.random.split(key, 3)

    N = 2
    # Predictions: flat (N, S*S*30), arbitrary real values (like raw net output).
    predictions = jax.random.normal(k1, (N, S * S * FEAT), dtype=jnp.float32)

    # Target: (N, S, S, 30). Classes / boxes in [0, 1]; objectness flag in {0, 1};
    # w/h positive so sqrt(target) is well-defined (as in real YOLO labels).
    target = jax.random.uniform(k2, (N, S, S, FEAT), dtype=jnp.float32)
    exists_flag = (jax.random.uniform(k3, (N, S, S)) > 0.5).astype(jnp.float32)
    target = target.at[..., 20].set(exists_flag)

    loss = jax.jit(yolo_loss)(predictions, target)
    jax.block_until_ready(loss)

    ref = yolo_loss_reference(predictions, target)
    np.testing.assert_allclose(np.asarray(loss), np.asarray(ref),
                               rtol=1e-4, atol=1e-2)
    print("KERNEL_OK")
</pallas_src>

<mosaic_0001>
module attributes {stable_mosaic.version = 11 : i64} {
  func.func @yolo_loss_kernel(%arg0: i32, %arg1: memref<30x128xf32, #tpu.memory_space<vmem>>, %arg2: memref<30x128xf32, #tpu.memory_space<vmem>>, %arg3: memref<1x1xf32, #tpu.memory_space<vmem>>) attributes {dimension_semantics = [#tpu.dimension_semantics<arbitrary>], iteration_bounds = array<i64: 1>, scalar_prefetch = 0 : i64, scratch_operands = 0 : i64, tpu.core_type = #tpu.core_type<tc>, window_params = [{transform_indices = @transform_0, window_bounds = array<i64: 30, 128>}, {transform_indices = @transform_1, window_bounds = array<i64: 30, 128>}, {pipeline_mode = #tpu.pipeline_mode<synchronous>, transform_indices = @transform_2, window_bounds = array<i64: 1, 1>}]} {
    %c21 = arith.constant 21 : index
    %c0 = arith.constant 0 : index
    %0 = vector.load %arg2[%c21, %c0] : memref<30x128xf32, #tpu.memory_space<vmem>>, vector<2x128xf32>
    %c23 = arith.constant 23 : index
    %c0_0 = arith.constant 0 : index
    %1 = vector.load %arg2[%c23, %c0_0] : memref<30x128xf32, #tpu.memory_space<vmem>>, vector<2x128xf32>
    %cst = arith.constant 5.000000e-01 : f32
    %2 = vector.broadcast %cst : f32 to vector<2x128xf32>
    %3 = arith.mulf %2, %1 : vector<2x128xf32>
    %4 = arith.subf %0, %3 : vector<2x128xf32>
    %5 = arith.addf %0, %3 : vector<2x128xf32>
    %6 = vector.extract_strided_slice %1 {offsets = [0, 0], sizes = [1, 128], strides = [1, 1]} : vector<2x128xf32> to vector<1x128xf32>
    %7 = vector.extract_strided_slice %1 {offsets = [1, 0], sizes = [1, 128], strides = [1, 1]} : vector<2x128xf32> to vector<1x128xf32>
    %8 = arith.mulf %6, %7 : vector<1x128xf32>
    %9 = math.absf %8 : vector<1x128xf32>
    %c21_1 = arith.constant 21 : index
    %c0_2 = arith.constant 0 : index
    %10 = vector.load %arg1[%c21_1, %c0_2] : memref<30x128xf32, #tpu.memory_space<vmem>>, vector<2x128xf32>
    %c23_3 = arith.constant 23 : index
    %c0_4 = arith.constant 0 : index
    %11 = vector.load %arg1[%c23_3, %c0_4] : memref<30x128xf32, #tpu.memory_space<vmem>>, vector<2x128xf32>
    %c26 = arith.constant 26 : index
    %c0_5 = arith.constant 0 : index
    %12 = vector.load %arg1[%c26, %c0_5] : memref<30x128xf32, #tpu.memory_space<vmem>>, vector<2x128xf32>
    %c28 = arith.constant 28 : index
    %c0_6 = arith.constant 0 : index
    %13 = vector.load %arg1[%c28, %c0_6] : memref<30x128xf32, #tpu.memory_space<vmem>>, vector<2x128xf32>
    %cst_7 = arith.constant 5.000000e-01 : f32
    %14 = vector.broadcast %cst_7 : f32 to vector<2x128xf32>
    %15 = arith.mulf %14, %11 : vector<2x128xf32>
    %16 = arith.subf %10, %15 : vector<2x128xf32>
    %17 = arith.maximumf %16, %4 : vector<2x128xf32>
    %18 = arith.addf %10, %15 : vector<2x128xf32>
    %19 = arith.minimumf %18, %5 : vector<2x128xf32>
    %20 = arith.subf %19, %17 : vector<2x128xf32>
    %cst_8 = arith.constant 0.000000e+00 : f32
    %21 = vector.broadcast %cst_8 : f32 to vector<2x128xf32>
    %22 = arith.maximumf %20, %21 : vector<2x128xf32>
    %23 = vector.extract_strided_slice %22 {offsets = [0, 0], sizes = [1, 128], strides = [1, 1]} : vector<2x128xf32> to vector<1x128xf32>
    %24 = vector.extract_strided_slice %22 {offsets = [1, 0], sizes = [1, 128], strides = [1, 1]} : vector<2x128xf32> to vector<1x128xf32>
    %25 = arith.mulf %23, %24 : vector<1x128xf32>
    %26 = vector.extract_strided_slice %11 {offsets = [0, 0], sizes = [1, 128], strides = [1, 1]} : vector<2x128xf32> to vector<1x128xf32>
    %27 = vector.extract_strided_slice %11 {offsets = [1, 0], sizes = [1, 128], strides = [1, 1]} : vector<2x128xf32> to vector<1x128xf32>
    %28 = arith.mulf %26, %27 : vector<1x128xf32>
    %29 = math.absf %28 : vector<1x128xf32>
    %30 = arith.addf %29, %9 : vector<1x128xf32>
    %31 = arith.subf %30, %25 : vector<1x128xf32>
    %cst_9 = arith.constant 9.99999997E-7 : f32
    %32 = vector.broadcast %cst_9 : f32 to vector<1x128xf32>
    %33 = arith.addf %31, %32 : vector<1x128xf32>
    %34 = arith.divf %25, %33 : vector<1x128xf32>
    %cst_10 = arith.constant 5.000000e-01 : f32
    %35 = vector.broadcast %cst_10 : f32 to vector<2x128xf32>
    %36 = arith.mulf %35, %13 : vector<2x128xf32>
    %37 = arith.subf %12, %36 : vector<2x128xf32>
    %38 = arith.maximumf %37, %4 : vector<2x128xf32>
    %39 = arith.addf %12, %36 : vector<2x128xf32>
    %40 = arith.minimumf %39, %5 : vector<2x128xf32>
    %41 = arith.subf %40, %38 : vector<2x128xf32>
    %cst_11 = arith.constant 0.000000e+00 : f32
    %42 = vector.broadcast %cst_11 : f32 to vector<2x128xf32>
    %43 = arith.maximumf %41, %42 : vector<2x128xf32>
    %44 = vector.extract_strided_slice %43 {offsets = [0, 0], sizes = [1, 128], strides = [1, 1]} : vector<2x128xf32> to vector<1x128xf32>
    %45 = vector.extract_strided_slice %43 {offsets = [1, 0], sizes = [1, 128], strides = [1, 1]} : vector<2x128xf32> to vector<1x128xf32>
    %46 = arith.mulf %44, %45 : vector<1x128xf32>
    %47 = vector.extract_strided_slice %13 {offsets = [0, 0], sizes = [1, 128], strides = [1, 1]} : vector<2x128xf32> to vector<1x128xf32>
    %48 = vector.extract_strided_slice %13 {offsets = [1, 0], sizes = [1, 128], strides = [1, 1]} : vector<2x128xf32> to vector<1x128xf32>
    %49 = arith.mulf %47, %48 : vector<1x128xf32>
    %50 = math.absf %49 : vector<1x128xf32>
    %51 = arith.addf %50, %9 : vector<1x128xf32>
    %52 = arith.subf %51, %46 : vector<1x128xf32>
    %cst_12 = arith.constant 9.99999997E-7 : f32
    %53 = vector.broadcast %cst_12 : f32 to vector<1x128xf32>
    %54 = arith.addf %52, %53 : vector<1x128xf32>
    %55 = arith.divf %46, %54 : vector<1x128xf32>
    %56 = arith.cmpf ogt, %55, %34 : vector<1x128xf32>
    %c20 = arith.constant 20 : index
    %c0_13 = arith.constant 0 : index
    %57 = vector.load %arg2[%c20, %c0_13] : memref<30x128xf32, #tpu.memory_space<vmem>>, vector<1x128xf32>
    %cst_14 = arith.constant 1.000000e+00 : f32
    %58 = vector.broadcast %cst_14 : f32 to vector<1x128xf32>
    %59 = arith.subf %58, %57 : vector<1x128xf32>
    %60 = vector.shape_cast %56 : vector<1x128xi1> to vector<1x128xi1>
    %61 = vector.broadcast %60 : vector<1x128xi1> to vector<2x128xi1>
    %62 = arith.select %61, %12, %10 : vector<2x128xi1>, vector<2x128xf32>
    %63 = vector.shape_cast %56 : vector<1x128xi1> to vector<1x128xi1>
    %64 = vector.broadcast %63 : vector<1x128xi1> to vector<2x128xi1>
    %65 = arith.select %64, %13, %11 : vector<2x128xi1>, vector<2x128xf32>
    %cst_15 = arith.constant 0.000000e+00 : f32
    %66 = vector.broadcast %cst_15 : f32 to vector<2x128xf32>
    %67 = arith.cmpf ogt, %65, %66 : vector<2x128xf32>
    %cst_16 = arith.constant 1.000000e+00 : f32
    %cst_17 = arith.constant 0.000000e+00 : f32
    %68 = vector.broadcast %cst_16 : f32 to vector<2x128xf32>
    %69 = vector.broadcast %cst_17 : f32 to vector<2x128xf32>
    %70 = arith.select %67, %68, %69 : vector<2x128xi1>, vector<2x128xf32>
    %cst_18 = arith.constant 0.000000e+00 : f32
    %71 = vector.broadcast %cst_18 : f32 to vector<2x128xf32>
    %72 = arith.cmpf olt, %65, %71 : vector<2x128xf32>
    %cst_19 = arith.constant 1.000000e+00 : f32
    %cst_20 = arith.constant 0.000000e+00 : f32
    %73 = vector.broadcast %cst_19 : f32 to vector<2x128xf32>
    %74 = vector.broadcast %cst_20 : f32 to vector<2x128xf32>
    %75 = arith.select %72, %73, %74 : vector<2x128xi1>, vector<2x128xf32>
    %76 = arith.subf %70, %75 : vector<2x128xf32>
    %cst_21 = arith.constant 9.99999997E-7 : f32
    %77 = vector.broadcast %cst_21 : f32 to vector<2x128xf32>
    %78 = arith.addf %65, %77 : vector<2x128xf32>
    %79 = math.absf %78 : vector<2x128xf32>
    %80 = math.sqrt %79 : vector<2x128xf32>
    %81 = arith.mulf %76, %80 : vector<2x128xf32>
    %cst_22 = arith.constant 0.000000e+00 : f32
    %82 = vector.broadcast %cst_22 : f32 to vector<2x128xf32>
    %83 = arith.maximumf %1, %82 : vector<2x128xf32>
    %84 = math.sqrt %83 : vector<2x128xf32>
    %85 = arith.subf %62, %0 : vector<2x128xf32>
    %86 = arith.mulf %85, %85 : vector<2x128xf32>
    %cst_23 = arith.constant dense<0.000000e+00> : vector<128xf32>
    %87 = vector.multi_reduction <add>, %86, %cst_23 [0] : vector<2x128xf32> to vector<128xf32>
    %88 = vector.shape_cast %87 : vector<128xf32> to vector<1x128xf32>
    %89 = arith.subf %81, %84 : vector<2x128xf32>
    %90 = arith.mulf %89, %89 : vector<2x128xf32>
    %cst_24 = arith.constant dense<0.000000e+00> : vector<128xf32>
    %91 = vector.multi_reduction <add>, %90, %cst_24 [0] : vector<2x128xf32> to vector<128xf32>
    %92 = vector.shape_cast %91 : vector<128xf32> to vector<1x128xf32>
    %93 = arith.addf %88, %92 : vector<1x128xf32>
    %94 = arith.mulf %57, %93 : vector<1x128xf32>
    %c20_25 = arith.constant 20 : index
    %c0_26 = arith.constant 0 : index
    %95 = vector.load %arg1[%c20_25, %c0_26] : memref<30x128xf32, #tpu.memory_space<vmem>>, vector<1x128xf32>
    %c25 = arith.constant 25 : index
    %c0_27 = arith.constant 0 : index
    %96 = vector.load %arg1[%c25, %c0_27] : memref<30x128xf32, #tpu.memory_space<vmem>>, vector<1x128xf32>
    %97 = arith.select %56, %96, %95 : vector<1x128xi1>, vector<1x128xf32>
    %98 = arith.subf %97, %57 : vector<1x128xf32>
    %99 = arith.mulf %98, %98 : vector<1x128xf32>
    %100 = arith.mulf %57, %99 : vector<1x128xf32>
    %101 = arith.subf %95, %57 : vector<1x128xf32>
    %102 = arith.mulf %101, %101 : vector<1x128xf32>
    %103 = arith.subf %96, %57 : vector<1x128xf32>
    %104 = arith.mulf %103, %103 : vector<1x128xf32>
    %105 = arith.addf %102, %104 : vector<1x128xf32>
    %106 = arith.mulf %59, %105 : vector<1x128xf32>
    %c0_28 = arith.constant 0 : index
    %c0_29 = arith.constant 0 : index
    %107 = vector.load %arg1[%c0_28, %c0_29] : memref<30x128xf32, #tpu.memory_space<vmem>>, vector<20x128xf32>
    %c0_30 = arith.constant 0 : index
    %c0_31 = arith.constant 0 : index
    %108 = vector.load %arg2[%c0_30, %c0_31] : memref<30x128xf32, #tpu.memory_space<vmem>>, vector<20x128xf32>
    %109 = arith.subf %107, %108 : vector<20x128xf32>
    %110 = arith.mulf %109, %109 : vector<20x128xf32>
    %cst_32 = arith.constant dense<0.000000e+00> : vector<128xf32>
    %111 = vector.multi_reduction <add>, %110, %cst_32 [0] : vector<20x128xf32> to vector<128xf32>
    %112 = vector.shape_cast %111 : vector<128xf32> to vector<1x128xf32>
    %113 = arith.mulf %57, %112 : vector<1x128xf32>
    %cst_33 = arith.constant 1.000000e+01 : f32
    %114 = vector.broadcast %cst_33 : f32 to vector<1x128xf32>
    %115 = arith.mulf %114, %94 : vector<1x128xf32>
    %116 = arith.addf %115, %100 : vector<1x128xf32>
    %cst_34 = arith.constant 4.000000e+00 : f32
    %117 = vector.broadcast %cst_34 : f32 to vector<1x128xf32>
    %118 = arith.mulf %117, %106 : vector<1x128xf32>
    %119 = arith.addf %116, %118 : vector<1x128xf32>
    %cst_35 = arith.constant 2.000000e+00 : f32
    %120 = vector.broadcast %cst_35 : f32 to vector<1x128xf32>
    %121 = arith.mulf %120, %113 : vector<1x128xf32>
    %122 = arith.addf %119, %121 : vector<1x128xf32>
    %123 = vector.shape_cast %122 : vector<1x128xf32> to vector<1x1x128xf32>
    %cst_36 = arith.constant dense<0.000000e+00> : vector<1xf32>
    %124 = vector.multi_reduction <add>, %123, %cst_36 [1, 2] : vector<1x1x128xf32> to vector<1xf32>
    %125 = vector.shape_cast %124 : vector<1xf32> to vector<1x1x1xf32>
    %126 = vector.extract %125[0, 0, 0] : f32 from vector<1x1x1xf32>
    %127 = vector.broadcast %126 : f32 to vector<1x1xf32>
    %c0_i32 = arith.constant 0 : i32
    %128 = arith.cmpi eq, %arg0, %c0_i32 : i32
    %129 = arith.extui %128 : i1 to i32
    %c0_i32_37 = arith.constant 0 : i32
    %130 = arith.cmpi ne, %129, %c0_i32_37 : i32
    scf.if %130 {
      %cst_42 = arith.constant 0.000000e+00 : f32
      %134 = vector.broadcast %cst_42 : f32 to vector<1x1xf32>
      %c0_43 = arith.constant 0 : index
      %c0_44 = arith.constant 0 : index
      %135 = vector.load %arg3[%c0_43, %c0_44] : memref<1x1xf32, #tpu.memory_space<vmem>>, vector<1x1xf32>
      tpu.vector_store %arg3[%c0_43, %c0_44], %134 {strides = array<i32>} : memref<1x1xf32, #tpu.memory_space<vmem>>, vector<1x1xf32>,
    } else {
    }
    %c0_38 = arith.constant 0 : index
    %c0_39 = arith.constant 0 : index
    %131 = vector.load %arg3[%c0_38, %c0_39] : memref<1x1xf32, #tpu.memory_space<vmem>>, vector<1x1xf32>
    %132 = arith.addf %131, %127 : vector<1x1xf32>
    %c0_40 = arith.constant 0 : index
    %c0_41 = arith.constant 0 : index
    %133 = vector.load %arg3[%c0_40, %c0_41] : memref<1x1xf32, #tpu.memory_space<vmem>>, vector<1x1xf32>
    tpu.vector_store %arg3[%c0_40, %c0_41], %132 {strides = array<i32>} : memref<1x1xf32, #tpu.memory_space<vmem>>, vector<1x1xf32>,
    return
  }
  func.func @transform_0(%arg0: i32) -> (i32, i32) {
    %c0_i32 = arith.constant 0 : i32
    %c0_i32_0 = arith.constant 0 : i32
    return %c0_i32, %arg0 : i32, i32
  }
  func.func @transform_1(%arg0: i32) -> (i32, i32) {
    %c0_i32 = arith.constant 0 : i32
    %c0_i32_0 = arith.constant 0 : i32
    return %c0_i32, %arg0 : i32, i32
  }
  func.func @transform_2(%arg0: i32) -> (i32, i32) {
    %c0_i32 = arith.constant 0 : i32
    %c0_i32_0 = arith.constant 0 : i32
    %c0_i32_1 = arith.constant 0 : i32
    return %c0_i32, %c0_i32_0 : i32, i32
  }
}

</mosaic_0001>

<bundles_post_ra>
// kernel: yolo_loss.1
= control target key start
LH: loop header
LB: loop body
LE: loop exit
PB: predicated region body
PF: predicated region fallthrough
CT: control target
= control target key end

     0   :  { %s335_s0 = inlined_call_operand.vmem [shape: f32[30,128], index: 0, kind: input, shape index: {}]   ;;  %s336_s1 = inlined_call_operand.vmem [shape: f32[30,128], index: 1, kind: input, shape index: {}]   ;;  %s337_s2 = inlined_call_operand.hbm [shape: f32[1,1], index: 2, kind: output, shape index: {}]  }
   0x1   :  { %v256_v0 = vld [vmem:[%s336_s1 + $0x15] sm:$0x3]  ;;  %v13_v1 = vld [vmem:[%s336_s1 + $0x17] sm:$0x3]  ;;  %v272_v6 = vld [vmem:[%s335_s0 + $0x1a] sm:$0x3] }
   0x2   :  { %v14_v2 = vmul.f32 0.5, %v13_v1  ;;  %v18_v3 = vrot.slane %v13_v1, 1  ;;  %v264_v4 = vld [vmem:[%s335_s0 + $0x15] sm:$0x3]  ;;  %v23_v5 = vld [vmem:[%s335_s0 + $0x17] sm:$0x3] }
   0x3   :  { %v25_v7 = vld [vmem:[%s335_s0 + $0x1c] sm:$0x3]  ;;  %v26_v8 = vmul.f32 0.5, %v23_v5  ;;  %v38_v9 = vrot.slane %v23_v5, 1 }
   0x4   :  { %v15_v10 = vsub.f32 %v256_v0, %v14_v2  ;;  %v16_v11 = vadd.f32 %v14_v2, %v256_v0  ;;  %v20_v12 = vmul.f32 %v18_v3, %v13_v1  ;;  %v47_v13 = vmul.f32 0.5, %v25_v7 }
   0x5   :  { %v27_v14 = vsub.f32 %v264_v4, %v26_v8  ;;  %v29_v15 = vadd.f32 %v26_v8, %v264_v4  ;;  %v40_v16 = vmul.f32 %v38_v9, %v23_v5  ;;  %v59_v17 = vrot.slane %v25_v7, 1 }
   0x6   :  { %v48_v18 = vsub.f32 %v272_v6, %v47_v13  ;;  %v50_v19 = vadd.f32 %v47_v13, %v272_v6 }
   0x7   :  { %v28_v20 = vmax.f32 %v27_v14, %v15_v10  ;;  %v30_v21 = vmin.f32 %v29_v15, %v16_v11  ;;  %v61_v22 = vmul.f32 %v59_v17, %v25_v7 }
   0x8   :  { %7 = vsyncpa [#allocation3], 0  ;;  %v49_v23 = vmax.f32 %v48_v18, %v15_v10  ;;  %v51_v24 = vmin.f32 %v50_v19, %v16_v11  ;;  %v21_v25 = vand.u32 2147483647, %v20_v12  ;;  %v41_v27 = vand.u32 2147483647, %v40_v16 }
   0x9   :  { %v31_v26 = vsub.f32 %v30_v21, %v28_v20  ;;  %v62_v29 = vand.u32 2147483647, %v61_v22  ;;  %v72_v42 = vlaneseq  ;;  %v94_v49 = vmax.f32 %v13_v1, 0.0  ;;  %v135_v54 = vld [vmem:[%s335_s0] sm:$0xff]  ;;  %v136_v56 = vld [vmem:[%s335_s0 + $0x8] sm:$0xff] }
   0xa   :  { %v52_v28 = vsub.f32 %v51_v24, %v49_v23  ;;  %v42_v33 = vadd.f32 %v41_v27, %v21_v25  ;;  %v235_v50 = vmov 0   ;;  %v138_v57 = vld [vmem:[%s336_s1] sm:$0xff]  ;;  %v139_v58 = vld [vmem:[%s336_s1 + $0x8] sm:$0xff]  ;;  %v137_v59 = vld [vmem:[%s335_s0 + $0x10] sm:$0xf]  ;;  %vm148_vm2 = vcmask 1043456  }
   0xb   :  { %v32_v30 = vmax.f32 %v31_v26, 0.0  ;;  %v63_v35 = vadd.f32 %v62_v29, %v21_v25  ;;  %v73_v43 = vshrl.u32 %v72_v42, 7  ;;  %v140_v60 = vld [vmem:[%s336_s1 + $0x10] sm:$0xf]  ;;  %v141_v63 = vsub.f32 %v135_v54, %v138_v57 }
   0xc   :  { %v53_v31 = vmax.f32 %v52_v28, 0.0  ;;  %v142_v1 = vsub.f32 %v136_v56, %v139_v58  ;;  %v143_v2 = vsub.f32 %v137_v59, %v140_v60  ;;  %vm104_vm3 = vcmask 1041408  }
   0xd   :  { %v34_v32 = vrot.slane %v32_v30, 1  ;;  %v74_v48 = vsub.s32 0, %v73_v43  ;;  %vm97_vm6 = vcmp.eq.f32.partialorder %v94_v49, inf  ;;  %vm99_vm7 = vcmp.eq.f32.partialorder %v94_v49, 0.0 }
   0xe   :  { %v55_v34 = vrot.slane %v53_v31, 1  ;;  %v146_v8 = vmul.f32 %v143_v2, %v143_v2  ;;  %v100_v18 = vand.u32 2147483648, %v94_v49  ;;  %vm164_vm10 = vcmask 1040384  }
   0xf   :  { %v36_v36 = vmul.f32 %v34_v32, %v32_v30  ;;  %v69_v32 = vld [vmem:[%s336_s1 + $0x14] sm:$0x1]  ;;  %vm180_vm11 = vcmask 0  }
  0x10   :  { %v57_v37 = vmul.f32 %v55_v34, %v53_v31  ;;  %v149_v12 = vsel %vm148_vm2, %v146_v8, 0.0  ;;  %v123_v34 = vld [vmem:[%s335_s0 + $0x14] sm:$0x1]  ;;  %v70_v54 = vsub.f32 1.0, %v69_v32 }
  0x11   :  { %v43_v38 = vsub.f32 %v42_v33, %v36_v36 }
  0x12   :  { %v64_v39 = vsub.f32 %v63_v35, %v57_v37  ;;  %v124_v35 = vld [vmem:[%s335_s0 + $0x19] sm:$0x1]  ;;  %s237_s0 = smov [#allocation2]  }
  0x13   :  { %v44_v40 = vadd.f32 1e-06, %v43_v38  ;;  %s192_s1 = sshll.u32 %s237_s0, 4  ;;  %s193_s1 = int_to_ptr.vmem [resolvable:$true] %s192_s1 }
  0x14   :  { %v65_v41 = vadd.f32 1e-06, %v64_v39  ;;  %s213_s12 = scalar_lea.vmem %s193_s1, 16  ;;  %s217_s13 = scalar_lea.vmem %s193_s1, 32 }
  0x15   :  { %205 = vrcp.f32 %v44_v40  ;;  %v129_v40 = vsub.f32 %v123_v34, %v69_v32  ;;  %p214_p0 = scmp.ne.s32.totalorder %s193_s1, %s213_s12  ;;  %p218_p1 = scmp.lt.s32.totalorder %s193_s1, %s193_s1 }
  0x16   :  { %207 = vrcp.f32 %v65_v41  ;;  %v131_v41 = vsub.f32 %v124_v35, %v69_v32  ;;  %p219_p2 = scmp.lt.s32.totalorder %s217_s13, %s213_s12 }
  0x17   :  { %209 = vrsqrt.f32 %v94_v49 }
  0x18   :  { %p220_p3 = por %p219_p2, %p218_p1 }
  0x1a   :  { %p221_p4 = pnand %p220_p3, %p214_p0 }
  0x22   :  { %v206_v44 = vpop.eup %205 }
  0x23   :  { %v208_v45 = vpop.eup %207  ;;  %v283_v46 = vmul.f32 %v206_v44, %v36_v36 }
  0x24   :  { %v285_v47 = vmul.f32 %v208_v45, %v57_v37  ;;  %v210_v10 = vpop.eup %209 }
  0x25   :  { %v96_v13 = vmul.f32 %v210_v10, %v94_v49 }
  0x26   :  { %vm68_vm0 = vcmp.gt.f32.partialorder %v285_v47, %v283_v46 }
  0x27   :  { %v71_v51 = vsel %vm68_vm0, 1, %v235_v50  ;;  %v98_v22 = vsel %vm97_vm6, %v94_v49, %v96_v13  ;;  %v125_v44 = vsel %vm68_vm0, %v124_v35, %v123_v34  ;;  %v130_v49 = vmul.f32 %v129_v40, %v129_v40 }
  0x28   :  { %v75_v52 = vrot.slane %v71_v51, %v74_v48  ;;  %v101_v26 = vsel %vm99_vm7, %v100_v18, %v98_v22  ;;  %v132_v50 = vmul.f32 %v131_v41, %v131_v41 }
  0x2a   :  { %vm76_vm1 = vcmp.eq.s32.totalorder %v75_v52, 1  ;;  %v126_v52 = vsub.f32 %v125_v44, %v69_v32  ;;  %v133_v57 = vadd.f32 %v132_v50, %v130_v49 }
  0x2b   :  { %v78_v53 = vsel %vm76_vm1, %v25_v7, %v23_v5  ;;  %v77_v62 = vsel %vm76_vm1, %v272_v6, %v264_v4  ;;  %v144_v5 = vmul.f32 %v141_v63, %v141_v63  ;;  %v145_v7 = vmul.f32 %v142_v1, %v142_v1 }
  0x2c   :  { %v84_v55 = vadd.f32 1e-06, %v78_v53  ;;  %v102_v3 = vsub.f32 %v77_v62, %v256_v0  ;;  %vm79_vm4 = vcmp.gt.f32.partialorder %v78_v53, 0.0  ;;  %vm81_vm5 = vcmp.lt.f32.partialorder %v78_v53, 0.0 }
  0x2d   :  { %v147_v11 = vadd.f32 %v145_v7, %v144_v5  ;;  %v236_v6 = vmov 0.0   ;;  %v127_v59 = vmul.f32 %v126_v52, %v126_v52  ;;  %v134_v62 = vmul.f32 %v133_v57, %v70_v54 }
  0x2e   :  { %v85_v61 = vand.u32 2147483647, %v84_v55  ;;  %v103_v9 = vmul.f32 %v102_v3, %v102_v3  ;;  %v80_v14 = vsel %vm79_vm4, 1.0, %v236_v6  ;;  %v82_v15 = vsel %vm81_vm5, 1.0, %v236_v6  ;;  %181 = vst.msk [vmem:[#allocation2] sm:$0x1] %vm180_vm11, %v236_v6 }
  0x2f   :  { %v150_v0 = vadd.f32 %v149_v12, %v147_v11  ;;  %v83_v20 = vsub.f32 %v80_v14, %v82_v15  ;;  %v128_v1 = vmul.f32 %v127_v59, %v69_v32  ;;  %v160_v2 = vmul.f32 4.0, %v134_v62 }
  0x30   :  { %211 = vrsqrt.f32 %v85_v61  ;;  %v105_v4 = vsel %vm104_vm3, %v103_v9, 0.0  ;;  %vm88_vm8 = vcmp.eq.f32.partialorder %v85_v61, inf  ;;  %v91_v17 = vand.u32 2147483648, %v85_v61 }
  0x31   :  { %v106_v19 = vrot.slane %v105_v4, 4  ;;  %vm90_vm9 = vcmp.eq.f32.partialorder %v85_v61, 0.0  ;;  %v151_v23 = vrot.slane %v150_v0, 4 }
  0x33   :  { %v107_v27 = vadd.f32 %v106_v19, %v105_v4  ;;  %v152_v29 = vadd.f32 %v151_v23, %v150_v0 }
  0x35   :  { %v108_v31 = vrot.slane %v107_v27, 2  ;;  %v153_v36 = vrot.slane %v152_v29, 2  ;;  %v182_v0 = vld [vmem:[#allocation2] sm:$0x1] }
  0x37   :  { %v109_v38 = vadd.f32 %v108_v31, %v107_v27  ;;  %v154_v43 = vadd.f32 %v153_v36, %v152_v29 }
  0x39   :  { %v110_v45 = vrot.slane %v109_v38, 1  ;;  %v155_v53 = vrot.slane %v154_v43, 1 }
  0x3b   :  { %v111_v55 = vadd.f32 %v110_v45, %v109_v38  ;;  %v156_v60 = vadd.f32 %v155_v53, %v154_v43 }
  0x3d   :  { %v212_v16 = vpop.eup %211  ;;  %v157_v46 = vmul.f32 %v156_v60, %v69_v32 }
  0x3e   :  { %v87_v21 = vmul.f32 %v212_v16, %v85_v61 }
  0x3f   :  { %v162_v5 = vmul.f32 2.0, %v157_v46 }
  0x40   :  { %v89_v24 = vsel %vm88_vm8, %v85_v61, %v87_v21 }
  0x41   :  { %v92_v25 = vsel %vm90_vm9, %v91_v17, %v89_v24 }
  0x42   :  { %v93_v28 = vmul.f32 %v92_v25, %v83_v20 }
  0x44   :  { %v112_v30 = vsub.f32 %v93_v28, %v101_v26 }
  0x46   :  { %v113_v33 = vmul.f32 %v112_v30, %v112_v30 }
  0x48   :  { %v114_v37 = vsel %vm104_vm3, %v113_v33, 0.0 }
  0x49   :  { %v115_v39 = vrot.slane %v114_v37, 4 }
  0x4b   :  { %v116_v42 = vadd.f32 %v115_v39, %v114_v37 }
  0x4d   :  { %v117_v48 = vrot.slane %v116_v42, 2 }
  0x4f   :  { %v118_v51 = vadd.f32 %v117_v48, %v116_v42 }
  0x51   :  { %v119_v56 = vrot.slane %v118_v51, 1 }
  0x53   :  { %v120_v58 = vadd.f32 %v119_v56, %v118_v51 }
  0x55   :  { %v121_v61 = vadd.f32 %v120_v58, %v111_v55 }
  0x57   :  { %v122_v63 = vmul.f32 %v121_v61, %v69_v32 }
  0x59   :  { %v158_v47 = vmul.f32 10.0, %v122_v63 }
  0x5b   :  { %v159_v3 = vadd.f32 %v158_v47, %v128_v1 }
  0x5d   :  { %v161_v7 = vadd.f32 %v160_v2, %v159_v3 }
  0x5f   :  { %v163_v8 = vadd.f32 %v162_v5, %v161_v7 }
  0x61   :  { %v165_v9 = vsel %vm164_vm10, %v163_v8, 0.0 }
  0x62   :  { %166 = vadd.xlane.f32.xlu0 %v165_v9 }
  0xeb   :  { %v167_v10 = vpop.xlane.xlu0 %166 }
  0xec   :  { %v168_v11 = vrot.slane %v167_v10, 4 }
  0xee   :  { %v169_v12 = vadd.f32 %v168_v11, %v167_v10 }
  0xf0   :  { %v170_v13 = vrot.slane %v169_v12, 2 }
  0xf2   :  { %v171_v4 = vadd.f32 %v170_v13, %v169_v12 }
  0xf4   :  { %v172_v14 = vrot.slane %v171_v4, 1 }
  0xf6   :  { %v173_v15 = vadd.f32 %v172_v14, %v171_v4 }
  0xf8   :  { %200 = vpush %v173_v15 }
 0x129   :  { %s201_s11 = spop %200 }
 0x12a   :  { %v175_v16 = vstv %s201_s11 }
 0x12b   :  { %v183_v17 = vadd.f32 %v182_v0, %v175_v16 }
 0x12d   :  { %185 = vst.msk [vmem:[#allocation2] sm:$0x1] %vm180_vm11, %v183_v17 }
 0x12e   :  { %224 = shalt.err (!%p221_p4)
}
 0x12f   :  { %195 = dma.vmem_to_hbm [thread:$0]  %s193_s1, 16, %s337_s2, [#allocation3]  }
 0x130   :  { %233 = dma.done.wait [#allocation3], 16  }
 0x131   :  { %234 = vsyncadd [#allocation3], 4294967280 }
 0x132   :  { %199 = vsyncpa [#allocation3], 1 }

</bundles_post_ra>
